<compile_context>
chip_gen: v5e
topology: v5e:2x2
jax: 0.10.0
libtpu: 0.0.40
codegen_flags: <defaults>
</compile_context>

<pallas_src>
import functools
import numpy as np

import jax
import jax.numpy as jnp
from jax import lax
from jax.experimental import pallas as pl
from jax.experimental.pallas import tpu as pltpu


def _round_up(x, m):
    return ((x + m - 1) // m) * m


def _maskcache_kernel(scale_ref, shift_ref, xyz_ref, maskT_ref, out_ref, *, I, J, K):
    # scale_ref, shift_ref : SMEM (3,)      f32
    # xyz_ref              : VMEM (3, TN)   f32   (tile of points, points along lanes)
    # maskT_ref            : VMEM (K, I*J)  bf16  (whole occupancy mask, transposed)
    # out_ref              : VMEM (1, TN)   i8    (0/1 per point, lane-dense)
    TN = xyz_ref.shape[1]
    IJ = I * J

    xyz = xyz_ref[...]                                              # (3, TN)

    def rnd(v):  # round half away from zero, like CUDA round()
        return jnp.where(v >= 0, jnp.floor(v + 0.5),
                         jnp.ceil(v - 0.5)).astype(jnp.int32)

    i = rnd(xyz[0:1, :] * scale_ref[0] + shift_ref[0])              # (1, TN)
    j = rnd(xyz[1:2, :] * scale_ref[1] + shift_ref[1])              # (1, TN)
    k = rnd(xyz[2:3, :] * scale_ref[2] + shift_ref[2])              # (1, TN)

    in_bounds = ((i >= 0) & (i < I) & (j >= 0) & (j < J)
                 & (k >= 0) & (k < K))                              # (1, TN)

    ij = jnp.clip(i, 0, I - 1) * J + jnp.clip(j, 0, J - 1)          # (1, TN)
    kc = jnp.clip(k, 0, K - 1)                                      # (1, TN)

    # Stage 1 (MXU): one-hot over the flattened (i, j) axis; contraction depth
    # is I*J and 0/1 values are exact in bf16 with f32 accumulation.
    # TODO(synk): the per-step (IJ, TN) iota is ~1/3 of the one-hot VALU work;
    # hoisting it into persistent scratch under @pl.when(program_id == 0) is
    # NOT megacore-safe with "parallel" semantics (core 1 never runs step 0),
    # so it stays inline.  For DVGO-scale masks (>=128^3) replace this whole
    # one-hot matmul with a true flat-index gather (O(1)/point) and/or tile the
    # I*J contraction as a trailing "arbitrary" grid axis.
    onehot_ij = (ij == lax.broadcasted_iota(jnp.int32, (IJ, TN), 0)
                 ).astype(jnp.bfloat16)                             # (IJ, TN)
    rows = jnp.dot(maskT_ref[...], onehot_ij,
                   preferred_element_type=jnp.float32)              # (K, TN)

    # Stage 2 (VPU + XLU): tiny one-hot select over k + sublane reduce (K rows).
    onehot_k = kc == lax.broadcasted_iota(jnp.int32, (K, TN), 0)    # (K, TN)
    val = jnp.sum(jnp.where(onehot_k, rows, 0.0),
                  axis=0, keepdims=True)                            # (1, TN)

    hit = (val > 0.5) & in_bounds
    out_ref[...] = hit.astype(jnp.int8)


class MaskCache:
    """JAX/Pallas port of warmup/lib/voxelMlp.MaskCache (mask/xyz_min/xyz_max branch)."""

    # TODO(synk): the `path is not None` branch of the original __init__
    # (torch.load + max_pool3d + softplus/alpha preprocessing of a checkpoint)
    # is checkpoint-loading glue and is intentionally not reproduced here.

    def __init__(self, mask, xyz_min, xyz_max, max_tile_n=2048):
        mask = jnp.asarray(mask).astype(bool)
        self.mask = mask
        self.xyz_min = jnp.asarray(xyz_min, jnp.float32)
        self.xyz_max = jnp.asarray(xyz_max, jnp.float32)
        xyz_len = self.xyz_max - self.xyz_min
        dims = jnp.asarray(mask.shape, jnp.float32)
        self.xyz2ijk_scale = (dims - 1.0) / xyz_len
        self.xyz2ijk_shift = -self.xyz_min * self.xyz2ijk_scale

        I, J, K = mask.shape
        self._IJK = (I, J, K)
        # Resident mask stored as (K, I*J) bf16: deep MXU contraction over I*J,
        # 0/1 values are exact in bf16.
        # TODO(synk): on v5e/v6e an int8 mask + int8 one-hot with int32
        # accumulation roughly doubles MXU headroom and halves resident bytes;
        # on v7x (no MXU int path) fp8 is the equivalent.  Kept bf16 here as
        # the proven-to-lower path on all generations.
        # TODO(synk): the constant-index mask block is double-buffered by the
        # pipeline even though it is never re-fetched; pipeline_mode=
        # pl.Buffered(1) would reclaim one mask footprint of VMEM (matters for
        # large masks on v7x's 64 MiB/TC).
        self._maskT = mask.reshape(I * J, K).T.astype(jnp.bfloat16)

        # --- generation-aware scoped-VMEM budget ---------------------------
        try:
            phys = int(pltpu.get_tpu_info().vmem_capacity_bytes)
        except Exception:
            phys = None
        if phys:
            ceiling = int(phys * 0.70)          # ~44 MiB on v7x, ~89 MiB on v5e/v6e
        else:
            ceiling = 40 << 20                  # safe everywhere
        ceiling = max(min(ceiling, 100 << 20), 32 << 20)

        mask_bytes = 2 * self._maskT.size * 2   # 2 pipeline buffers, bf16
        want = mask_bytes + (16 << 20)          # mask + generous tile/internal headroom
        self._vmem_limit = int(min(max(want, 32 << 20), ceiling))

        # --- VMEM-budgeted lane tile ---------------------------------------
        # Conservative per-point temporary footprint: (IJ,TN) i32 iota +
        # (IJ,TN) bf16 one-hot + a few (K,TN)/(1,TN) f32 temps + xyz/out blocks.
        per_pt = 8 * I * J + 16 * K + 128
        avail = max(self._vmem_limit - mask_bytes - (8 << 20), 4 << 20)
        tn = int(avail // per_pt)
        self.tile_n = int(min(max((tn // 128) * 128, 256), int(max_tile_n)))

    def __call__(self, xyz):
        I, J, K = self._IJK
        batch_shape = xyz.shape[:-1]
        pts = jnp.asarray(xyz, jnp.float32).reshape(-1, 3)
        n = pts.shape[0]

        # Tile size: VMEM-budgeted, shrunk for small N, and capped so the grid
        # keeps >= 2 steps (lets "parallel" shard across v7x's two TensorCores).
        tn = min(self.tile_n, _round_up(max(n, 1), 128))
        if n > 128:
            tn = min(tn, _round_up(-(-n // 2), 128))
        tn = max(tn, 128)
        n_pad = max(-(-n // tn), 1) * tn

        # Lane-dense point layout: points along lanes -> (3, n_pad).
        # TODO(synk): this pad+transpose is one extra XLA copy pass (~24 B/pt);
        # it disappears entirely if the producer supplies SoA (3, N) points.
        # An in-kernel (tn,3)->(3,tn) relayout was considered and rejected:
        # a minor-dim-3 Mosaic transpose is not guaranteed to lower.
        pts_t = jnp.pad(pts, ((0, n_pad - n), (0, 0))).T

        kernel = functools.partial(_maskcache_kernel, I=I, J=J, K=K)
        out = pl.pallas_call(
            kernel,
            out_shape=jax.ShapeDtypeStruct((1, n_pad), jnp.int8),
            grid=(n_pad // tn,),
            in_specs=[
                pl.BlockSpec(memory_space=pltpu.MemorySpace.SMEM),   # scale (3,)
                pl.BlockSpec(memory_space=pltpu.MemorySpace.SMEM),   # shift (3,)
                pl.BlockSpec((3, tn), lambda b: (0, b)),             # xyz tile (lane-dense)
                pl.BlockSpec((K, I * J), lambda b: (0, 0)),          # whole mask (constant -> 1 DMA)
            ],
            out_specs=pl.BlockSpec((1, tn), lambda b: (0, b)),       # lane-dense i8 output
            compiler_params=pltpu.CompilerParams(
                dimension_semantics=("parallel",),
                vmem_limit_bytes=self._vmem_limit),
        )(self.xyz2ijk_scale, self.xyz2ijk_shift, pts_t, self._maskT)

        out = out[0, :n] != 0
        return out.reshape(batch_shape)


if __name__ == "__main__":
    key = jax.random.PRNGKey(0)
    k_mask, k_xyz = jax.random.split(key)

    # Deterministic synthetic occupancy grid + (non-cubic) bounding box.
    I, J, K = 16, 12, 9
    mask = jax.random.uniform(k_mask, (I, J, K)) > 0.5
    xyz_min = jnp.array([-1.0, -1.2, -0.8], jnp.float32)
    xyz_max = jnp.array([1.0, 0.9, 1.1], jnp.float32)

    mc = MaskCache(mask, xyz_min, xyz_max)

    # Query points; range exceeds the box so some points are out-of-bounds
    # (must return False). 600 points -> 2 lane-dense grid steps.
    B, S = 2, 300
    xyz = jax.random.uniform(k_xyz, (B, S, 3), minval=-1.4, maxval=1.4,
                             dtype=jnp.float32)

    out = jax.block_until_ready(mc(xyz))

    # Pure-numpy reference of the CUDA maskcache_lookup semantics.
    mask_np = np.asarray(mask)
    scale = np.asarray(mc.xyz2ijk_scale)
    shift = np.asarray(mc.xyz2ijk_shift)
    pts = np.asarray(xyz, dtype=np.float32).reshape(-1, 3)
    f = pts * scale + shift
    idx = np.where(f >= 0, np.floor(f + 0.5), np.ceil(f - 0.5)).astype(np.int32)
    dims = np.array([I, J, K], np.int32)
    inb = ((idx >= 0) & (idx < dims)).all(axis=1)
    ci = np.clip(idx, 0, dims - 1)
    ref = np.zeros(pts.shape[0], dtype=bool)
    ref[inb] = mask_np[ci[inb, 0], ci[inb, 1], ci[inb, 2]]
    ref = ref.reshape(B, S)

    assert out.shape == (B, S), out.shape
    assert out.dtype == jnp.bool_, out.dtype
    np.testing.assert_array_equal(np.asarray(out), ref)
    print("KERNEL_OK")
</pallas_src>

<mosaic_0001>
module attributes {stable_mosaic.version = 11 : i64} {
  func.func @_maskcache_kernel(%arg0: i32, %arg1: memref<3xf32, #tpu.memory_space<smem>>, %arg2: memref<3xf32, #tpu.memory_space<smem>>, %arg3: memref<3x384xf32, #tpu.memory_space<vmem>>, %arg4: memref<9x192xbf16, #tpu.memory_space<vmem>>, %arg5: memref<1x384xi8, #tpu.memory_space<vmem>>) attributes {dimension_semantics = [#tpu.dimension_semantics<parallel>], iteration_bounds = array<i64: 2>, scalar_prefetch = 0 : i64, scratch_operands = 0 : i64, tpu.core_type = #tpu.core_type<tc>, window_params = [{transform_indices = @transform_0, window_bounds = array<i64: 3>}, {transform_indices = @transform_1, window_bounds = array<i64: 3>}, {transform_indices = @transform_2, window_bounds = array<i64: 3, 384>}, {pipeline_mode = #tpu.pipeline_mode<synchronous>, transform_indices = @transform_3, window_bounds = array<i64: 9, 192>}, {transform_indices = @transform_4, window_bounds = array<i64: 1, 384>}]} {
    %c0 = arith.constant 0 : index
    %c0_0 = arith.constant 0 : index
    %0 = vector.load %arg3[%c0, %c0_0] : memref<3x384xf32, #tpu.memory_space<vmem>>, vector<3x384xf32>
    %1 = vector.extract_strided_slice %0 {offsets = [0, 0], sizes = [1, 384], strides = [1, 1]} : vector<3x384xf32> to vector<1x384xf32>
    %c0_1 = arith.constant 0 : index
    %2 = memref.load %arg1[%c0_1] : memref<3xf32, #tpu.memory_space<smem>>
    %3 = vector.broadcast %2 : f32 to vector<1x384xf32>
    %4 = arith.mulf %1, %3 : vector<1x384xf32>
    %c0_2 = arith.constant 0 : index
    %5 = memref.load %arg2[%c0_2] : memref<3xf32, #tpu.memory_space<smem>>
    %6 = vector.broadcast %5 : f32 to vector<1x384xf32>
    %7 = arith.addf %4, %6 : vector<1x384xf32>
    %cst = arith.constant 0.000000e+00 : f32
    %8 = vector.broadcast %cst : f32 to vector<1x384xf32>
    %9 = arith.cmpf oge, %7, %8 : vector<1x384xf32>
    %cst_3 = arith.constant 5.000000e-01 : f32
    %10 = vector.broadcast %cst_3 : f32 to vector<1x384xf32>
    %11 = arith.addf %7, %10 : vector<1x384xf32>
    %12 = math.floor %11 : vector<1x384xf32>
    %cst_4 = arith.constant 5.000000e-01 : f32
    %13 = vector.broadcast %cst_4 : f32 to vector<1x384xf32>
    %14 = arith.subf %7, %13 : vector<1x384xf32>
    %15 = math.ceil %14 : vector<1x384xf32>
    %16 = arith.select %9, %12, %15 : vector<1x384xi1>, vector<1x384xf32>
    %17 = arith.fptosi %16 : vector<1x384xf32> to vector<1x384xi32>
    %18 = vector.extract_strided_slice %0 {offsets = [1, 0], sizes = [1, 384], strides = [1, 1]} : vector<3x384xf32> to vector<1x384xf32>
    %c1 = arith.constant 1 : index
    %19 = memref.load %arg1[%c1] : memref<3xf32, #tpu.memory_space<smem>>
    %20 = vector.broadcast %19 : f32 to vector<1x384xf32>
    %21 = arith.mulf %18, %20 : vector<1x384xf32>
    %c1_5 = arith.constant 1 : index
    %22 = memref.load %arg2[%c1_5] : memref<3xf32, #tpu.memory_space<smem>>
    %23 = vector.broadcast %22 : f32 to vector<1x384xf32>
    %24 = arith.addf %21, %23 : vector<1x384xf32>
    %cst_6 = arith.constant 0.000000e+00 : f32
    %25 = vector.broadcast %cst_6 : f32 to vector<1x384xf32>
    %26 = arith.cmpf oge, %24, %25 : vector<1x384xf32>
    %cst_7 = arith.constant 5.000000e-01 : f32
    %27 = vector.broadcast %cst_7 : f32 to vector<1x384xf32>
    %28 = arith.addf %24, %27 : vector<1x384xf32>
    %29 = math.floor %28 : vector<1x384xf32>
    %cst_8 = arith.constant 5.000000e-01 : f32
    %30 = vector.broadcast %cst_8 : f32 to vector<1x384xf32>
    %31 = arith.subf %24, %30 : vector<1x384xf32>
    %32 = math.ceil %31 : vector<1x384xf32>
    %33 = arith.select %26, %29, %32 : vector<1x384xi1>, vector<1x384xf32>
    %34 = arith.fptosi %33 : vector<1x384xf32> to vector<1x384xi32>
    %35 = vector.extract_strided_slice %0 {offsets = [2, 0], sizes = [1, 384], strides = [1, 1]} : vector<3x384xf32> to vector<1x384xf32>
    %c2 = arith.constant 2 : index
    %36 = memref.load %arg1[%c2] : memref<3xf32, #tpu.memory_space<smem>>
    %37 = vector.broadcast %36 : f32 to vector<1x384xf32>
    %38 = arith.mulf %35, %37 : vector<1x384xf32>
    %c2_9 = arith.constant 2 : index
    %39 = memref.load %arg2[%c2_9] : memref<3xf32, #tpu.memory_space<smem>>
    %40 = vector.broadcast %39 : f32 to vector<1x384xf32>
    %41 = arith.addf %38, %40 : vector<1x384xf32>
    %cst_10 = arith.constant 0.000000e+00 : f32
    %42 = vector.broadcast %cst_10 : f32 to vector<1x384xf32>
    %43 = arith.cmpf oge, %41, %42 : vector<1x384xf32>
    %cst_11 = arith.constant 5.000000e-01 : f32
    %44 = vector.broadcast %cst_11 : f32 to vector<1x384xf32>
    %45 = arith.addf %41, %44 : vector<1x384xf32>
    %46 = math.floor %45 : vector<1x384xf32>
    %cst_12 = arith.constant 5.000000e-01 : f32
    %47 = vector.broadcast %cst_12 : f32 to vector<1x384xf32>
    %48 = arith.subf %41, %47 : vector<1x384xf32>
    %49 = math.ceil %48 : vector<1x384xf32>
    %50 = arith.select %43, %46, %49 : vector<1x384xi1>, vector<1x384xf32>
    %51 = arith.fptosi %50 : vector<1x384xf32> to vector<1x384xi32>
    %c0_i32 = arith.constant 0 : i32
    %52 = vector.broadcast %c0_i32 : i32 to vector<1x384xi32>
    %53 = arith.cmpi sge, %17, %52 : vector<1x384xi32>
    %c16_i32 = arith.constant 16 : i32
    %54 = vector.broadcast %c16_i32 : i32 to vector<1x384xi32>
    %55 = arith.cmpi slt, %17, %54 : vector<1x384xi32>
    %56 = arith.andi %53, %55 : vector<1x384xi1>
    %c0_i32_13 = arith.constant 0 : i32
    %57 = vector.broadcast %c0_i32_13 : i32 to vector<1x384xi32>
    %58 = arith.cmpi sge, %34, %57 : vector<1x384xi32>
    %59 = arith.andi %56, %58 : vector<1x384xi1>
    %c12_i32 = arith.constant 12 : i32
    %60 = vector.broadcast %c12_i32 : i32 to vector<1x384xi32>
    %61 = arith.cmpi slt, %34, %60 : vector<1x384xi32>
    %62 = arith.andi %59, %61 : vector<1x384xi1>
    %c0_i32_14 = arith.constant 0 : i32
    %63 = vector.broadcast %c0_i32_14 : i32 to vector<1x384xi32>
    %64 = arith.cmpi sge, %51, %63 : vector<1x384xi32>
    %65 = arith.andi %62, %64 : vector<1x384xi1>
    %c9_i32 = arith.constant 9 : i32
    %66 = vector.broadcast %c9_i32 : i32 to vector<1x384xi32>
    %67 = arith.cmpi slt, %51, %66 : vector<1x384xi32>
    %68 = arith.andi %65, %67 : vector<1x384xi1>
    %c0_i32_15 = arith.constant 0 : i32
    %c15_i32 = arith.constant 15 : i32
    %69 = vector.broadcast %c0_i32_15 : i32 to vector<1x384xi32>
    %70 = arith.maxsi %69, %17 : vector<1x384xi32>
    %71 = vector.broadcast %c15_i32 : i32 to vector<1x384xi32>
    %72 = arith.minsi %71, %70 : vector<1x384xi32>
    %c12_i32_16 = arith.constant 12 : i32
    %73 = vector.broadcast %c12_i32_16 : i32 to vector<1x384xi32>
    %74 = arith.muli %72, %73 : vector<1x384xi32>
    %c0_i32_17 = arith.constant 0 : i32
    %c11_i32 = arith.constant 11 : i32
    %75 = vector.broadcast %c0_i32_17 : i32 to vector<1x384xi32>
    %76 = arith.maxsi %75, %34 : vector<1x384xi32>
    %77 = vector.broadcast %c11_i32 : i32 to vector<1x384xi32>
    %78 = arith.minsi %77, %76 : vector<1x384xi32>
    %79 = arith.addi %74, %78 : vector<1x384xi32>
    %c0_i32_18 = arith.constant 0 : i32
    %c8_i32 = arith.constant 8 : i32
    %80 = vector.broadcast %c0_i32_18 : i32 to vector<1x384xi32>
    %81 = arith.maxsi %80, %51 : vector<1x384xi32>
    %82 = vector.broadcast %c8_i32 : i32 to vector<1x384xi32>
    %83 = arith.minsi %82, %81 : vector<1x384xi32>
    %84 = tpu.iota {dimensions = array<i32: 0>} : vector<192x384xi32>
    %85 = vector.broadcast %79 : vector<1x384xi32> to vector<192x384xi32>
    %86 = arith.cmpi eq, %85, %84 : vector<192x384xi32>
    %87 = arith.extui %86 : vector<192x384xi1> to vector<192x384xi32>
    %88 = arith.sitofp %87 : vector<192x384xi32> to vector<192x384xf32>
    %89 = arith.truncf %88 : vector<192x384xf32> to vector<192x384xbf16>
    %c0_19 = arith.constant 0 : index
    %c0_20 = arith.constant 0 : index
    %90 = vector.load %arg4[%c0_19, %c0_20] : memref<9x192xbf16, #tpu.memory_space<vmem>>, vector<9x192xbf16>
    %cst_21 = arith.constant dense<0.000000e+00> : vector<9x384xf32>
    %91 = tpu.matmul %90, %89, %cst_21 {dimension_numbers = #tpu.dot_dimension_numbers<[1], [0], [0], [1], [0, 0, 1, 1], [], []>} : vector<9x192xbf16>, vector<192x384xbf16>, vector<9x384xf32> -> vector<9x384xf32>
    %92 = tpu.iota {dimensions = array<i32: 0>} : vector<9x384xi32>
    %93 = vector.broadcast %83 : vector<1x384xi32> to vector<9x384xi32>
    %94 = arith.cmpi eq, %93, %92 : vector<9x384xi32>
    %cst_22 = arith.constant 0.000000e+00 : f32
    %95 = vector.broadcast %cst_22 : f32 to vector<9x384xf32>
    %96 = arith.select %94, %91, %95 : vector<9x384xi1>, vector<9x384xf32>
    %cst_23 = arith.constant dense<0.000000e+00> : vector<384xf32>
    %97 = vector.multi_reduction <add>, %96, %cst_23 [0] : vector<9x384xf32> to vector<384xf32>
    %98 = vector.shape_cast %97 : vector<384xf32> to vector<1x384xf32>
    %cst_24 = arith.constant 5.000000e-01 : f32
    %99 = vector.broadcast %cst_24 : f32 to vector<1x384xf32>
    %100 = arith.cmpf ogt, %98, %99 : vector<1x384xf32>
    %101 = arith.andi %100, %68 : vector<1x384xi1>
    %102 = arith.extui %101 : vector<1x384xi1> to vector<1x384xi8>
    %c0_25 = arith.constant 0 : index
    %c0_26 = arith.constant 0 : index
    %103 = vector.load %arg5[%c0_25, %c0_26] : memref<1x384xi8, #tpu.memory_space<vmem>>, vector<1x384xi8>
    tpu.vector_store %arg5[%c0_25, %c0_26], %102 {strides = array<i32>} : memref<1x384xi8, #tpu.memory_space<vmem>>, vector<1x384xi8>,
    return
  }
  func.func @transform_0(%arg0: i32) -> i32 {
    %c0_i32 = arith.constant 0 : i32
    %c0_i32_0 = arith.constant 0 : i32
    return %c0_i32 : i32
  }
  func.func @transform_1(%arg0: i32) -> i32 {
    %c0_i32 = arith.constant 0 : i32
    %c0_i32_0 = arith.constant 0 : i32
    return %c0_i32 : i32
  }
  func.func @transform_2(%arg0: i32) -> (i32, i32) {
    %c0_i32 = arith.constant 0 : i32
    %c0_i32_0 = arith.constant 0 : i32
    return %c0_i32, %arg0 : i32, i32
  }
  func.func @transform_3(%arg0: i32) -> (i32, i32) {
    %c0_i32 = arith.constant 0 : i32
    %c0_i32_0 = arith.constant 0 : i32
    %c0_i32_1 = arith.constant 0 : i32
    return %c0_i32, %c0_i32_0 : i32, i32
  }
  func.func @transform_4(%arg0: i32) -> (i32, i32) {
    %c0_i32 = arith.constant 0 : i32
    %c0_i32_0 = arith.constant 0 : i32
    return %c0_i32, %arg0 : i32, i32
  }
}

</mosaic_0001>

<bundles_post_ra>
// kernel: tpu_custom_call.1
= control target key start
LH: loop header
LB: loop body
LE: loop exit
PB: predicated region body
PF: predicated region fallthrough
CT: control target
= control target key end

     0   :  { %9 = vsyncpa [#allocation5], 0  ;;  %s2109_s0 = inlined_call_operand.hbm [shape: f32[3], index: 0, kind: input, shape index: {}]   ;;  %s2110_s1 = inlined_call_operand.hbm [shape: f32[3], index: 1, kind: input, shape index: {}]   ;;  %s2111_s2 = inlined_call_operand.hbm [shape: f32[3,768], index: 2, kind: input, shape index: {}]   ;;  %s2112_s3 = inlined_call_operand.hbm [shape: bf16[9,192], index: 3, kind: input, shape index: {}]   ;;  %s2113_s4 = inlined_call_operand.hbm [shape: s8[1,768], index: 4, kind: output, shape index: {}]  }
   0x1   :  { %10 = vsyncpa [#allocation7], 0 }
   0x2   :  { %11 = vsyncpa [#allocation3], 0 }
   0x3   :  { %13 = vsyncpa [#allocation3 + $0x1], 0 }
   0x4   :  { %14 = vsyncpa [#allocation10], 0 }
   0x5   :  { %15 = vsyncpa [#allocation4], 0 }
   0x6   :  { %17 = vsyncpa [#allocation4 + $0x1], 0  ;;  %s1506_s15 = smov 0   ;;  %s1508_s16 = smov 0  }
   0x7   :  { %s1510_s17 = smov 0   ;;  %s1512_s18 = smov 0  }
   0x8 LB: > { %s1527_s19 = sadd.s32 4294967295, %s1472_s18   ;;  %s1017_s20 = sadd.s32 4294967294, %s1472_s18   ;;  %s1472_s18 = sphi %s1512_s18, %s2143_s18   ;;  %s1468_s17 = sphi %s1510_s17, %s2142_s17   ;;  %s1464_s16 = sphi %s1508_s16, %s2141_s16   ;;  %s1460_s15 = sphi %s1506_s15, %s2140_s15  }
   0x9   : > { %p85_p0 = scmp.ne.s32.totalorder %s1464_s16, %s1460_s15  ;;  %p86_p1 = scmp.eq.s32.totalorder %s1527_s19, 0 }
   0xa   : > { %p130_p2 = scmp.eq.s32.totalorder %s1527_s19, 1  ;;  %p136_p3 = scmp.eq.s32.totalorder %s1017_s20, 1 }
   0xb   : > { %p1536_p4 = por %p86_p1, %p85_p0  ;;  %p1018_p5 = scmp.ge.s32.totalorder %s1472_s18, 1 }
   0xc   : > { %p1541_p6 = por %p136_p3, %p85_p0  ;;  %p143_p7 = scmp.lt.s32.totalorder %s1472_s18, 3 }
   0xd   : > { %s155_s25 = sshll.u32 %s2109_s0, 4  ;;  %s165_s29 = sshll.u32 %s2110_s1, 4  ;;  %s156_s25 = int_to_ptr.hbm [resolvable:$true] %s155_s25  ;;  %s166_s29 = int_to_ptr.hbm [resolvable:$true] %s165_s29 }
   0xe   : > { %p1549_p8 = pnand %p1018_p5, %p143_p7  ;;  %s174_s6 = sshll.u32 %s2112_s3, 4  ;;  %s175_s6 = int_to_ptr.hbm [resolvable:$true] %s174_s6 }
   0xf   : > { %s1474_s7 = smov [#allocation9]   ;;  %s1475_s9 = smov [#allocation2]  }
  0x10   : > { %p1239_p10 = pneg %p1549_p8  ;;  %s176_s8 = sshll.u32 %s1474_s7, 4  ;;  %s177_s8 = int_to_ptr.vmem [resolvable:$true] %s176_s8 }
  0x11   : > { %s1476_s10 = smov [#allocation6]   ;;  %s1477_s11 = smov 128  }
  0x12   : > { %p1240_p11 = pnand %p1239_p10, %p86_p1  ;;  %s1478_s12 = smov 8  }
  0x13   : > { %s1565_s13 = sadd.s32 1, %s1472_s18   ;;  %s72_s20 = sadd.s32 1, %s1468_s17 }
  0x14   : > { %1242 = dma.hbm_to_smem (!%p1240_p11), %s156_s25, 16, %s1475_s9, [#allocation5]  }
  0x15   : > { %1245 = dma.hbm_to_smem (!%p1240_p11), %s166_s29, 16, %s1476_s10, [#allocation7]  }
  0x16   : > { %1248 = dma.hbm_to_vmem [thread:$0]  (!%p1240_p11), %s175_s6, 256, %s177_s8, [#allocation10], %s1477_s11, %s1477_s11, %s1478_s12  }
  0x17   : > { %s69_s14 = ssub.s32 %s1472_s18, %s1565_s13  ;;  %p79_p13 = scmp.ne.s32.totalorder %s1468_s17, %s1464_s16 }
  0x18   : > { %p70_p12 = scmp.eq.s32.totalorder %s69_s14, 0  ;;  %p80_p0 = scmp.eq.s32.totalorder %s1472_s18, 0 }
  0x19   : > { %p1260_p3 = scmp.lt.s32.totalorder %s1472_s18, 2  ;;  %p1579_p7 = por %p130_p2, %p79_p13 }
  0x1a   : > { %s1575_s23 = scalar_select %p70_p12, %s1468_s17, %s72_s20  }
  0x1b   : > { %p81_p5 = por %p80_p0, %p79_p13  ;;  %s190_s25 = sand.u32 1, %s1468_s17  }
  0x1c   : > { %s1205_s27 = smul.u32 12, %s1472_s18  ;;  %s191_s10 = scalar_lea.sflag [#allocation3], %s190_s25 }
  0x1d   : > { %s1208_s28 = smul.u32 12, %s190_s25  ;;  %p1588_p10 = pnand %p1260_p3, %p81_p5 }
  0x1e   : > { %s199_s5 = scalar_lea.hbm %s2111_s2, %s1205_s27  ;;  %s1371_s27 = scalar_lea.hbm %s2111_s2, 24 }
  0x1f   : > { %s201_s7 = sshll.u32 %s199_s5, 4  ;;  %s194_s8 = scalar_lea.vmem [#allocation8], %s1208_s28  ;;  %s202_s7 = int_to_ptr.hbm [resolvable:$true] %s201_s7 }
  0x20   : > { %s203_s9 = sshll.u32 %s194_s8, 4  ;;  %s1364_s11 = sshra.s32 %s202_s7, 4  ;;  %s204_s9 = int_to_ptr.vmem [resolvable:$true] %s203_s9  ;;  %s1365_s11 = int_to_ptr.hbm [resolvable:$true] %s1364_s11 }
  0x21   : > { %s1366_s12 = scalar_lea.hbm %s1365_s11, 12  ;;  %p1368_p11 = pneg %p1588_p10 }
  0x22   : > { %p1367_p2 = scmp.ne.s32.totalorder %s1365_s11, %s1366_s12  ;;  %p1372_p0 = scmp.lt.s32.totalorder %s1365_s11, %s2111_s2 }
  0x23   : > { %p1373_p3 = scmp.lt.s32.totalorder %s1371_s27, %s1366_s12 }
  0x24   : > { %p1369_p12 = pnand %p1368_p11, %p1367_p2 }
  0x25   : > { %p1374_p5 = por %p1373_p3, %p1372_p0 }
  0x26   : > { %p1370_p13 = pneg %p1369_p12 }
  0x28   : > { %p1375_p9 = pnand %p1374_p5, %p1370_p13 }
  0x2a   : > { %1378 = shalt.err (!%p1375_p9)
}
  0x2b   : > { %1252 = dma.hbm_to_vmem [thread:$0]  (!%p1588_p10), %s202_s7, 192, %s204_s9, %s191_s10  }
  0x2c   : > { %212 = sbr.rel (%p1549_p8) target bundleno = 310 (0x136), region = 36 }
  0x31   : > { %1439 = dma.done.wait (%p86_p1), [#allocation5], 16  }
  0x32   : > { %1441 = vsyncadd (%p86_p1), [#allocation5], 4294967280 }
  0x33   : > { %1443 = dma.done.wait (%p86_p1), [#allocation7], 16  }
  0x34   : > { %1445 = vsyncadd (%p86_p1), [#allocation7], 4294967280  ;;  %s1613_s25 = sand.u32 1, %s1464_s16  }
  0x35   : > { %s1209_s26 = smul.u32 12, %s1613_s25  ;;  %s225_s28 = scalar_lea.sflag [#allocation3], %s1613_s25 }
  0x37   : > { %s228_s5 = scalar_lea.vmem [#allocation8], %s1209_s26 }
  0x38   : > { %1447 = dma.done.wait (%p1536_p4), %s225_s28, 192  }
  0x39   : > { %1449 = vsyncadd (%p1536_p4), %s225_s28, 4294967104 }
  0x3a   : > { %1451 = dma.done.wait (%p86_p1), [#allocation10], 256  }
  0x3b   : > { %1453 = vsyncadd (%p86_p1), [#allocation10], 4294967040 }
  0x3c   : > { %239 = sfence }
  0x3d   : > { %s267_s6 = sld [smem:[#allocation2]]  ;;  %v1627_v0 = vld [vmem:[%s228_s5] sm:$0x77]  ;;  %v1629_v1 = vld [vmem:[%s228_s5 + $0x8] sm:$0x7]  ;;  %v419_v29 = vlaneseq  ;;  %s1210_s11 = smul.u32 3, %s1613_s25 }
  0x3e   : > { %s271_s7 = sld [smem:[#allocation6]]  ;;  %v1479_v63 = vmov 1.0|1.0   ;;  %s907_s12 = smul.u32 3, %s1527_s19 }
  0x3f   : > { %s1030_s8 = sld [smem:[#allocation2 + $0x1]]  ;;  %v1646_v41 = vshrl.u32 %v419_v29, 7  ;;  %s259_s19 = scalar_lea.vmem [#allocation11], %s1210_s11 }
  0x40   : > { %s1625_s9 = sld [smem:[#allocation6 + $0x1]]  ;;  %s910_s27 = scalar_lea.hbm %s2113_s4, %s907_s12 }
  0x41   : > { %v1653_v48 = vadd.s32 112, %v1646_v41  ;;  %v1657_v49 = vadd.s32 120, %v1646_v41  ;;  %v1660_v50 = vadd.s32 176, %v1646_v41  ;;  %v1663_v51 = vadd.s32 184, %v1646_v41  ;;  %s1034_s21 = sld [smem:[#allocation2 + $0x2]]  ;;  %s912_s29 = sshll.u32 %s259_s19, 4  ;;  %s913_s29 = int_to_ptr.vmem [resolvable:$true] %s912_s29 }
  0x42   : > { %v1671_v57 = vadd.s32 96, %v1646_v41  ;;  %v1674_v58 = vadd.s32 104, %v1646_v41  ;;  %v1677_v59 = vadd.s32 160, %v1646_v41  ;;  %v1680_v60 = vadd.s32 168, %v1646_v41  ;;  %s1035_s10 = sld [smem:[#allocation6 + $0x2]]  ;;  %s914_s30 = sshll.u32 %s910_s27, 4  ;;  %s915_s30 = int_to_ptr.hbm [resolvable:$true] %s914_s30 }
  0x43   : > { %v268_v2 = vstv %s267_s6  ;;  %s900_s26 = scalar_lea.sflag [#allocation4], %s1613_s25  ;;  %s1408_s28 = sshra.s32 %s915_s30, 4  ;;  %s1409_s28 = int_to_ptr.hbm [resolvable:$true] %s1408_s28 }
  0x44   : > { %v269_v3 = vmul.f32 %v268_v2, %v1627_v0  ;;  %v272_v4 = vstv %s271_s7  ;;  %v270_v5 = vmul.f32 %v268_v2, %v1629_v1  ;;  %v1704_v2 = vadd.s32 80, %v1646_v41  ;;  %s1410_s5 = scalar_lea.hbm %s1409_s28, 3  ;;  %p1415_p9 = scmp.lt.s32.totalorder %s1409_s28, %s2113_s4 }
  0x45   : > { %v290_v6 = vstv %s1030_s8  ;;  %p1411_p1 = scmp.ne.s32.totalorder %s1409_s28, %s1410_s5  ;;  %s1414_s8 = scalar_lea.hbm %s2113_s4, 6 }
  0x46   : > { %v273_v7 = vadd.f32 %v272_v4, %v269_v3  ;;  %v291_v8 = vmul.f32 %v290_v6, %v1627_v0  ;;  %v294_v9 = vstv %s1625_s9  ;;  %v274_v10 = vadd.f32 %v272_v4, %v270_v5  ;;  %p1416_p10 = scmp.lt.s32.totalorder %s1414_s8, %s1410_s5 }
  0x47   : > { %v292_v16 = vmul.f32 %v290_v6, %v1629_v1  ;;  %v1707_v3 = vadd.s32 88, %v1646_v41  ;;  %v1715_v4 = vadd.s32 144, %v1646_v41  ;;  %v1718_v5 = vadd.s32 152, %v1646_v41  ;;  %p1412_p4 = pnand %p1411_p1, %p1579_p7 }
  0x48   : > { %v277_v11 = vadd.f32 0.5, %v273_v7  ;;  %v1028_v12 = vadd.f32 -0.5, %v273_v7  ;;  %v295_v13 = vadd.f32 %v294_v9, %v291_v8  ;;  %vm275_vm0 = vcmp.ge.f32.partialorder %v273_v7, 0.0  ;;  %p1417_p2 = por %p1416_p10, %p1415_p9 }
  0x49   : > { %v278_v14 = vadd.f32 0.5, %v274_v10  ;;  %v1029_v15 = vadd.f32 -0.5, %v274_v10  ;;  %vm276_vm1 = vcmp.ge.f32.partialorder %v274_v10, 0.0  ;;  %v296_v27 = vadd.f32 %v294_v9, %v292_v16  ;;  %p1413_p8 = pneg %p1412_p4 }
  0x4a   : > { %v279_v17 = vfloor.f32 %v277_v11  ;;  %v283_v18 = vceil.f32 %v1028_v12  ;;  %v299_v19 = vadd.f32 0.5, %v295_v13  ;;  %v1032_v20 = vadd.f32 -0.5, %v295_v13 }
  0x4b   : > { %vm297_vm2 = vcmp.ge.f32.partialorder %v295_v13, 0.0  ;;  %v280_v23 = vfloor.f32 %v278_v14  ;;  %v284_v26 = vceil.f32 %v1029_v15  ;;  %v300_v34 = vadd.f32 0.5, %v296_v27  ;;  %p1418_p11 = pnand %p1417_p2, %p1413_p8 }
  0x4c   : > { %v285_v21 = vsel %vm275_vm0, %v279_v17, %v283_v18  ;;  %v301_v22 = vfloor.f32 %v299_v19  ;;  %v305_v25 = vceil.f32 %v1032_v20  ;;  %v1033_v35 = vadd.f32 -0.5, %v296_v27  ;;  %v1206_v17 = vld [vmem:[#allocation9 + $0x4] sm:$0xf]  ;;  %v1124_v18 = vld [vmem:[#allocation9 + $0x8] sm:$0x10] }
  0x4d   : > { %v1636_v24 = vcvt.f32.s32 %v285_v21  ;;  %v286_v30 = vsel %vm276_vm1, %v280_v23, %v284_v26  ;;  %vm298_vm6 = vcmp.ge.f32.partialorder %v296_v27, 0.0  ;;  %v302_v37 = vfloor.f32 %v300_v34  ;;  %v1122_v26 = vld [vmem:[#allocation9] sm:$0xf]  ;;  %v1207_v27 = vld [vmem:[#allocation9 + $0x4] sm:$0x10] }
  0x4e   : > { %v307_v28 = vsel %vm297_vm2, %v301_v22, %v305_v25  ;;  %v1642_v33 = vcvt.f32.s32 %v286_v30  ;;  %v306_v39 = vceil.f32 %v1033_v35  ;;  %v1751_v8 = vadd.s32 64, %v1646_v41 }
  0x4f   : > { %vm387_vm3 = vcmp.gt.s32.totalorder %v1636_v24, 0  ;;  %v1639_v31 = vcvt.f32.s32 %v307_v28  ;;  %v1754_v9 = vadd.s32 72, %v1646_v41  ;;  %v1765_v10 = vadd.s32 128, %v1646_v41 }
  0x50   : > { %v388_v32 = vsel %vm387_vm3, %v1636_v24, 0  ;;  %vm389_vm8 = vcmp.gt.s32.totalorder %v1642_v33, 0  ;;  %v308_v43 = vsel %vm298_vm6, %v302_v37, %v306_v39  ;;  %v1768_v11 = vadd.s32 136, %v1646_v41 }
  0x51   : > { %vm391_vm4 = vcmp.lt.s32.totalorder %v388_v32, 15  ;;  %vm397_vm5 = vcmp.gt.s32.totalorder %v1639_v31, 0  ;;  %v1649_v45 = vcvt.f32.s32 %v308_v43  ;;  %v390_v46 = vsel %vm389_vm8, %v1642_v33, 0 }
  0x52   : > { %v392_v36 = vsel %vm391_vm4, %v388_v32, 15  ;;  %v398_v38 = vsel %vm397_vm5, %v1639_v31, 0  ;;  %vm393_vm10 = vcmp.lt.s32.totalorder %v390_v46, 15  ;;  %v1800_v14 = vadd.s32 48, %v1646_v41 }
  0x53   : > { %v395_v40 = vmul.u32 12, %v392_v36  ;;  %vm401_vm7 = vcmp.lt.s32.totalorder %v398_v38, 11  ;;  %vm399_vm9 = vcmp.gt.s32.totalorder %v1649_v45, 0  ;;  %v394_v61 = vsel %vm393_vm10, %v390_v46, 15 }
  0x54   : > { %v402_v42 = vsel %vm401_vm7, %v398_v38, 11  ;;  %v400_v52 = vsel %vm399_vm9, %v1649_v45, 0  ;;  %v396_v6 = vmul.u32 12, %v394_v61  ;;  %v1803_v15 = vadd.s32 56, %v1646_v41 }
  0x55   : > { %v1046_v44 = vrot.slane %v402_v42, 9  ;;  %vm403_vm11 = vcmp.lt.s32.totalorder %v400_v52, 11  ;;  %v1837_v19 = vadd.s32 32, %v1646_v41  ;;  %v1840_v20 = vadd.s32 40, %v1646_v41 }
  0x56   : > { %v404_v62 = vsel %vm403_vm11, %v400_v52, 11  ;;  %v1846_v21 = vor.u32 %v1206_v17, %v1124_v18  ;;  %v1873_v22 = vadd.s32 16, %v1646_v41  ;;  %v1876_v23 = vadd.s32 24, %v1646_v41 }
  0x57   : > { %v409_v47 = vadd.s32 %v1046_v44, %v395_v40  ;;  %v1047_v7 = vrot.slane %v404_v62, 9  ;;  %v1910_v25 = vadd.s32 8, %v1646_v41  ;;  %v1123_v28 = vor.u32 %v1207_v27, %v1122_v26 }
  0x58   : > { %v312_v29 = vstv %s1034_s21  ;;  %v316_v32 = vstv %s1035_s10 }
  0x59   : > { %v444_v53 = vperm.slane %v409_v47, 0  ;;  %v445_v54 = vperm.slane %v409_v47, 4  ;;  %v410_v12 = vadd.s32 %v1047_v7, %v396_v6  ;;  %v313_v30 = vmul.f32 %v312_v29, %v1627_v0 }
  0x5a   : > { %v314_v40 = vmul.f32 %v312_v29, %v1629_v1  ;;  %v1480_v1 = vmov 0  }
  0x5b   : > { %v1666_v55 = vperm.slane %v444_v53, 0  ;;  %v1668_v56 = vperm.slane %v445_v54, 0  ;;  %v446_v13 = vperm.slane %v410_v12, 0  ;;  %v317_v34 = vadd.f32 %v316_v32, %v313_v30 }
  0x5c   : > { %v318_v43 = vadd.f32 %v316_v32, %v314_v40 }
  0x5d   : > { %vm492_vm12 = vcmp.eq.s32.totalorder %v1666_v55, %v1653_v48  ;;  %vm495_vm13 = vcmp.eq.s32.totalorder %v1666_v55, %v1657_v49  ;;  %vm516_vm14 = vcmp.eq.s32.totalorder %v1666_v55, %v1660_v50  ;;  %vm519_vm15 = vcmp.eq.s32.totalorder %v1666_v55, %v1663_v51 }
  0x5e   : > { %vm1128_vm0 = vmpackc.low %vm495_vm13, %vm492_vm12  ;;  %vm493_vm1 = vcmp.eq.s32.totalorder %v1668_v56, %v1653_v48  ;;  %vm496_vm2 = vcmp.eq.s32.totalorder %v1668_v56, %v1657_v49  ;;  %vm517_vm3 = vcmp.eq.s32.totalorder %v1668_v56, %v1660_v50  ;;  %vm520_vm4 = vcmp.eq.s32.totalorder %v1668_v56, %v1663_v51 }
  0x5f   : > { %1129 = vmatpush.bf16.msk.msra.mxu0 %vm1128_vm0, %v1479_v63  ;;  %vm1144_vm5 = vmpackc.low %vm519_vm15, %vm516_vm14  ;;  %vm486_vm6 = vcmp.eq.s32.totalorder %v1666_v55, %v1671_v57  ;;  %vm489_vm7 = vcmp.eq.s32.totalorder %v1666_v55, %v1674_v58  ;;  %vm510_vm9 = vcmp.eq.s32.totalorder %v1666_v55, %v1677_v59  ;;  %vm513_vm10 = vcmp.eq.s32.totalorder %v1666_v55, %v1680_v60 }
  0x60   : > { %1145 = vmatpush.bf16.msk.msra.mxu1 %vm1144_vm5, %v1479_v63  ;;  %vm1153_vm8 = vmpackc.low %vm496_vm2, %vm493_vm1  ;;  %vm487_vm12 = vcmp.eq.s32.totalorder %v1668_v56, %v1671_v57  ;;  %vm490_vm13 = vcmp.eq.s32.totalorder %v1668_v56, %v1674_v58  ;;  %vm511_vm15 = vcmp.eq.s32.totalorder %v1668_v56, %v1677_v59  ;;  %vm514_vm0 = vcmp.eq.s32.totalorder %v1668_v56, %v1680_v60 }
  0x61   : > { %1154 = vmatpush.bf16.msk.msra.mxu2 %vm1153_vm8, %v1479_v63  ;;  %vm1169_vm11 = vmpackc.low %vm520_vm4, %vm517_vm3  ;;  %vm480_vm2 = vcmp.eq.s32.totalorder %v1666_v55, %v1704_v2  ;;  %vm483_vm3 = vcmp.eq.s32.totalorder %v1666_v55, %v1707_v3  ;;  %vm504_vm5 = vcmp.eq.s32.totalorder %v1666_v55, %v1715_v4  ;;  %vm481_vm8 = vcmp.eq.s32.totalorder %v1668_v56, %v1704_v2 }
  0x62   : > { %1170 = vmatpush.bf16.msk.msra.mxu3 %vm1169_vm11, %v1479_v63  ;;  %vm1130_vm14 = vmpackc.low %vm489_vm7, %vm486_vm6  ;;  %vm507_vm6 = vcmp.eq.s32.totalorder %v1666_v55, %v1718_v5  ;;  %vm505_vm11 = vcmp.eq.s32.totalorder %v1668_v56, %v1715_v4  ;;  %v1810_v16 = vperm.slane %v446_v13, 0  ;;  %v321_v35 = vadd.f32 0.5, %v317_v34 }
  0x63   : > { %1131 = vmatpush.bf16.msk.msra.mxu0 %vm1130_vm14, %v1479_v63  ;;  %vm1146_vm1 = vmpackc.low %vm513_vm10, %vm510_vm9  ;;  %vm484_vm9 = vcmp.eq.s32.totalorder %v1668_v56, %v1707_v3  ;;  %vm474_vm14 = vcmp.eq.s32.totalorder %v1666_v55, %v1751_v8  ;;  %v1036_v36 = vadd.f32 -0.5, %v317_v34  ;;  %v322_v44 = vadd.f32 0.5, %v318_v43 }
  0x64   : > { %1147 = vmatpush.bf16.msk.msra.mxu1 %vm1146_vm1, %v1479_v63  ;;  %vm1155_vm4 = vmpackc.low %vm490_vm13, %vm487_vm12  ;;  %vm508_vm12 = vcmp.eq.s32.totalorder %v1668_v56, %v1718_v5  ;;  %vm498_vm1 = vcmp.eq.s32.totalorder %v1666_v55, %v1765_v10  ;;  %v323_v37 = vfloor.f32 %v321_v35  ;;  %v1037_v46 = vadd.f32 -0.5, %v318_v43 }
  0x65   : > { %1156 = vmatpush.bf16.msk.msra.mxu2 %vm1155_vm4, %v1479_v63  ;;  %vm1171_vm7 = vmpackc.low %vm514_vm0, %vm511_vm15  ;;  %vm477_vm15 = vcmp.eq.s32.totalorder %v1666_v55, %v1754_v9  ;;  %vm475_vm4 = vcmp.eq.s32.totalorder %v1668_v56, %v1751_v8  ;;  %v327_v38 = vceil.f32 %v1036_v36 }
  0x66   : > { %1172 = vmatpush.bf16.msk.msra.mxu3 %vm1171_vm7, %v1479_v63  ;;  %vm1132_vm10 = vmpackc.low %vm483_vm3, %vm480_vm2  ;;  %vm501_vm2 = vcmp.eq.s32.totalorder %v1666_v55, %v1768_v11  ;;  %vm499_vm7 = vcmp.eq.s32.totalorder %v1668_v56, %v1765_v10  ;;  %v328_v0 = vceil.f32 %v1037_v46 }
  0x67   : > { %1133 = vmatpush.bf16.msk.msra.mxu0 %vm1132_vm10, %v1479_v63  ;;  %vm1148_vm13 = vmpackc.low %vm507_vm6, %vm504_vm5  ;;  %vm478_vm5 = vcmp.eq.s32.totalorder %v1668_v56, %v1754_v9  ;;  %vm494_vm10 = vcmp.eq.s32.totalorder %v1810_v16, %v1653_v48 }
  0x68   : > { %1149 = vmatpush.bf16.msk.msra.mxu1 %vm1148_vm13, %v1479_v63  ;;  %vm1157_vm0 = vmpackc.low %vm484_vm9, %vm481_vm8  ;;  %vm502_vm8 = vcmp.eq.s32.totalorder %v1668_v56, %v1768_v11  ;;  %vm468_vm13 = vcmp.eq.s32.totalorder %v1666_v55, %v1800_v14 }
  0x69   : > { %1158 = vmatpush.bf16.msk.msra.mxu2 %vm1157_vm0, %v1479_v63  ;;  %vm1173_vm3 = vmpackc.low %vm508_vm12, %vm505_vm11  ;;  %vm497_vm11 = vcmp.eq.s32.totalorder %v1810_v16, %v1657_v49  ;;  %vm469_vm0 = vcmp.eq.s32.totalorder %v1668_v56, %v1800_v14  ;;  %v324_v49 = vfloor.f32 %v322_v44 }
  0x6a   : > { %1174 = vmatpush.bf16.msk.msra.mxu3 %vm1173_vm3, %v1479_v63  ;;  %vm1134_vm6 = vmpackc.low %vm477_vm15, %vm474_vm14  ;;  %vm471_vm14 = vcmp.eq.s32.totalorder %v1666_v55, %v1803_v15  ;;  %vm713_vm3 = vcmask 523264  }
  0x6b   : > { %1135 = vmatpush.bf16.msk.msra.mxu0 %vm1134_vm6, %v1479_v63  ;;  %vm1150_vm9 = vmpackc.low %vm501_vm2, %vm498_vm1  ;;  %vm472_vm1 = vcmp.eq.s32.totalorder %v1668_v56, %v1803_v15 }
  0x6c   : > { %1151 = vmatpush.bf16.msk.msra.mxu1 %vm1150_vm9, %v1479_v63  ;;  %vm1159_vm12 = vmpackc.low %vm478_vm5, %vm475_vm4  ;;  %vm518_vm4 = vcmp.eq.s32.totalorder %v1810_v16, %v1660_v50  ;;  %vm521_vm5 = vcmp.eq.s32.totalorder %v1810_v16, %v1663_v51 }
  0x6d   : > { %1160 = vmatpush.bf16.msk.msra.mxu2 %vm1159_vm12, %v1479_v63  ;;  %vm1175_vm15 = vmpackc.low %vm502_vm8, %vm499_vm7  ;;  %vm488_vm7 = vcmp.eq.s32.totalorder %v1810_v16, %v1671_v57  ;;  %vm491_vm8 = vcmp.eq.s32.totalorder %v1810_v16, %v1674_v58 }
  0x6e   : > { %1176 = vmatpush.bf16.msk.msra.mxu3 %vm1175_vm15, %v1479_v63  ;;  %vm1178_vm2 = vmpackc.low %vm497_vm11, %vm494_vm10  ;;  %vm462_vm10 = vcmp.eq.s32.totalorder %v1666_v55, %v1837_v19  ;;  %vm465_vm11 = vcmp.eq.s32.totalorder %v1666_v55, %v1840_v20 }
  0x6f   : > { %vm1136_vm6 = vmpackc.low %vm471_vm14, %vm468_vm13  ;;  %1152 = vmatmul.msk.bf16.vlgmr.msra.gmra.mxu1 %vm713_vm3, %v1846_v21  ;;  %vm463_vm13 = vcmp.eq.s32.totalorder %v1668_v56, %v1837_v19  ;;  %vm466_vm14 = vcmp.eq.s32.totalorder %v1668_v56, %v1840_v20 }
  0x70   : > { %1179 = vmatpush.bf16.msk.msrb.mxu1 %vm1178_vm2, %v1479_v63  ;;  %1137 = vmatpush.bf16.msk.msra.mxu0 %vm1136_vm6, %v1479_v63  ;;  %vm1161_vm9 = vmpackc.low %vm472_vm1, %vm469_vm0  ;;  %vm512_vm0 = vcmp.eq.s32.totalorder %v1810_v16, %v1677_v59  ;;  %vm515_vm1 = vcmp.eq.s32.totalorder %v1810_v16, %v1680_v60 }
  0x71   : > { %1177 = vmatmul.msk.bf16.vlgmr.msra.gmra.mxu3 %vm713_vm3, %v1846_v21  ;;  %1162 = vmatpush.bf16.msk.msra.mxu2 %vm1161_vm9, %v1479_v63  ;;  %vm1194_vm12 = vmpackc.low %vm521_vm5, %vm518_vm4  ;;  %vm482_vm4 = vcmp.eq.s32.totalorder %v1810_v16, %v1704_v2  ;;  %vm485_vm5 = vcmp.eq.s32.totalorder %v1810_v16, %v1707_v3 }
  0x72   : > { %1195 = vmatpush.bf16.msk.msrb.mxu3 %vm1194_vm12, %v1479_v63  ;;  %vm1180_vm15 = vmpackc.low %vm491_vm8, %vm488_vm7  ;;  %vm456_vm7 = vcmp.eq.s32.totalorder %v1666_v55, %v1873_v22  ;;  %vm459_vm8 = vcmp.eq.s32.totalorder %v1666_v55, %v1876_v23 }
  0x73   : > { %vm1138_vm2 = vmpackc.low %vm465_vm11, %vm462_vm10  ;;  %vm457_vm10 = vcmp.eq.s32.totalorder %v1668_v56, %v1873_v22  ;;  %vm460_vm11 = vcmp.eq.s32.totalorder %v1668_v56, %v1876_v23 }
  0x74   : > { %1181 = vmatpush.bf16.msk.msrb.mxu1 %vm1180_vm15, %v1479_v63  ;;  %1139 = vmatpush.bf16.msk.msra.mxu0 %vm1138_vm2, %v1479_v63  ;;  %vm1163_vm6 = vmpackc.low %vm466_vm14, %vm463_vm13  ;;  %vm506_vm13 = vcmp.eq.s32.totalorder %v1810_v16, %v1715_v4  ;;  %vm509_vm14 = vcmp.eq.s32.totalorder %v1810_v16, %v1718_v5 }
  0x75   : > { %1164 = vmatpush.bf16.msk.msra.mxu2 %vm1163_vm6, %v1479_v63  ;;  %vm1196_vm9 = vmpackc.low %vm515_vm1, %vm512_vm0  ;;  %vm476_vm0 = vcmp.eq.s32.totalorder %v1810_v16, %v1751_v8  ;;  %vm479_vm1 = vcmp.eq.s32.totalorder %v1810_v16, %v1754_v9 }
  0x76   : > { %1197 = vmatpush.bf16.msk.msrb.mxu3 %vm1196_vm9, %v1479_v63  ;;  %vm1182_vm12 = vmpackc.low %vm485_vm5, %vm482_vm4  ;;  %vm450_vm4 = vcmp.eq.s32.totalorder %v1666_v55, %v1646_v41  ;;  %vm453_vm5 = vcmp.eq.s32.totalorder %v1666_v55, %v1910_v25 }
  0x77   : > { %vm1140_vm15 = vmpackc.low %vm459_vm8, %vm456_vm7  ;;  %vm451_vm7 = vcmp.eq.s32.totalorder %v1668_v56, %v1646_v41  ;;  %vm454_vm8 = vcmp.eq.s32.totalorder %v1668_v56, %v1910_v25 }
  0x78   : > { %1183 = vmatpush.bf16.msk.msrb.mxu1 %vm1182_vm12, %v1479_v63  ;;  %1141 = vmatpush.bf16.msk.msra.mxu0 %vm1140_vm15, %v1479_v63  ;;  %vm1165_vm2 = vmpackc.low %vm460_vm11, %vm457_vm10  ;;  %vm500_vm10 = vcmp.eq.s32.totalorder %v1810_v16, %v1765_v10  ;;  %vm503_vm11 = vcmp.eq.s32.totalorder %v1810_v16, %v1768_v11 }
  0x79   : > { %1166 = vmatpush.bf16.msk.msra.mxu2 %vm1165_vm2, %v1479_v63  ;;  %vm1198_vm6 = vmpackc.low %vm509_vm14, %vm506_vm13  ;;  %vm470_vm13 = vcmp.eq.s32.totalorder %v1810_v16, %v1800_v14  ;;  %vm473_vm14 = vcmp.eq.s32.totalorder %v1810_v16, %v1803_v15  ;;  %vm467_vm2 = vcmp.eq.s32.totalorder %v1810_v16, %v1840_v20 }
  0x7a   : > { %1199 = vmatpush.bf16.msk.msrb.mxu3 %vm1198_vm6, %v1479_v63  ;;  %vm1184_vm9 = vmpackc.low %vm479_vm1, %vm476_vm0  ;;  %vm464_vm1 = vcmp.eq.s32.totalorder %v1810_v16, %v1837_v19  ;;  %vm458_vm6 = vcmp.eq.s32.totalorder %v1810_v16, %v1873_v22 }
  0x7b   : > { %vm1142_vm12 = vmpackc.low %vm453_vm5, %vm450_vm4 }
  0x7c   : > { %1185 = vmatpush.bf16.msk.msrb.mxu1 %vm1184_vm9, %v1479_v63  ;;  %1143 = vmatpush.bf16.msk.msra.mxu0 %vm1142_vm12, %v1479_v63  ;;  %vm1167_vm15 = vmpackc.low %vm454_vm8, %vm451_vm7  ;;  %vm461_vm7 = vcmp.eq.s32.totalorder %v1810_v16, %v1876_v23  ;;  %vm452_vm9 = vcmp.eq.s32.totalorder %v1810_v16, %v1646_v41 }
  0x7d   : > { %1168 = vmatpush.bf16.msk.msra.mxu2 %vm1167_vm15, %v1479_v63  ;;  %vm1200_vm0 = vmpackc.low %vm503_vm11, %vm500_vm10  ;;  %vm455_vm10 = vcmp.eq.s32.totalorder %v1810_v16, %v1910_v25  ;;  %vm339_vm15 = vcmp.ge.s32.totalorder %v1639_v31, 0 }
  0x7e   : > { %1201 = vmatpush.bf16.msk.msrb.mxu3 %vm1200_vm0, %v1479_v63  ;;  %vm1186_vm4 = vmpackc.low %vm473_vm14, %vm470_vm13  ;;  %vm320_vm14 = vcmp.ge.f32.partialorder %v318_v43, 0.0  ;;  %v341_v56 = vsel %vm339_vm15, 1, %v1480_v1  ;;  %vm351_vm0 = vcmp.lt.s32.totalorder %v1639_v31, 12  ;;  %vm352_vm15 = vcmp.lt.s32.totalorder %v1649_v45, 12 }
  0x7f   : > { %725 = vmatmul.bf16.vlgmr.msra.gmra.mxu0 %v1123_v28  ;;  %vm1188_vm5 = vmpackc.low %vm467_vm2, %vm464_vm1  ;;  %v330_v52 = vsel %vm320_vm14, %v324_v49, %v328_v0  ;;  %v1038_v59 = vrot.slane %v341_v56, 9  ;;  %v353_v60 = vsel %vm351_vm0, 1, %v1480_v1 }
  0x80   : > { %1187 = vmatpush.bf16.msk.msrb.mxu1 %vm1186_vm4, %v1479_v63  ;;  %753 = vmatmul.bf16.vlgmr.msra.gmra.mxu2 %v1123_v28  ;;  %vm1190_vm8 = vmpackc.low %vm461_vm7, %vm458_vm6  ;;  %v1971_v55 = vcvt.f32.s32 %v330_v52  ;;  %vm333_vm4 = vcmp.ge.s32.totalorder %v1636_v24, 0  ;;  %v1040_v2 = vrot.slane %v353_v60, 9 }
  0x81   : > { %1202 = vmatmul.msk.bf16.vlgmr.msrb.gmra.mxu3 %vm713_vm3, %v1846_v21  ;;  %vm1192_vm11 = vmpackc.low %vm455_vm10, %vm452_vm9  ;;  %vm319_vm3 = vcmp.ge.f32.partialorder %v317_v34, 0.0  ;;  %vm1986_vm9 = vcmp.ne.s32.totalorder %v1038_v59, 0  ;;  %v354_v21 = vsel %vm352_vm15, 1, %v1480_v1 }
  0x82   : > { %v329_v39 = vsel %vm319_vm3, %v323_v37, %v327_v38  ;;  %vm413_vm2 = vcmp.gt.s32.totalorder %v1971_v55, 0  ;;  %vm819_vm3 = vcmask 1040384   ;;  %vm359_vm14 = vcmp.ne.s32.totalorder %v1040_v2, 0 }
  0x83   : > { %v1220_v42 = vcvt.f32.s32 %v329_v39  ;;  %v414_v3 = vsel %vm413_vm2, %v1971_v55, 0  ;;  %v1041_v32 = vrot.slane %v354_v21, 9 }
  0x84   : > { %1189 = vmatpush.bf16.msk.msrb.mxu1 %vm1188_vm5, %v1479_v63  ;;  %vm335_vm5 = vcmp.lt.s32.totalorder %v1636_v24, 16 }
  0x85   : > { %vm411_vm12 = vcmp.gt.s32.totalorder %v1220_v42, 0  ;;  %vm363_vm1 = vcmp.ge.s32.totalorder %v1220_v42, 0  ;;  %vm375_vm6 = vcmp.lt.s32.totalorder %v1220_v42, 9  ;;  %vm360_vm15 = vcmp.ne.s32.totalorder %v1041_v32, 0 }
  0x86   : > { %v412_v47 = vsel %vm411_vm12, %v1220_v42, 0  ;;  %v365_v61 = vsel %vm363_vm1, 1, %v1480_v1  ;;  %v377_v8 = vsel %vm375_vm6, 1, %v1480_v1  ;;  %vm417_vm12 = vcmp.lt.s32.totalorder %v414_v3, 8 }
  0x87   : > { %vm415_vm13 = vcmp.lt.s32.totalorder %v412_v47, 8  ;;  %v1042_v7 = vrot.slane %v365_v61, 10  ;;  %v1044_v14 = vrot.slane %v377_v8, 10  ;;  %v418_v19 = vsel %vm417_vm12, %v414_v3, 8 }
  0x88   : > { %1191 = vmatpush.bf16.msk.msrb.mxu1 %vm1190_vm8, %v1479_v63  ;;  %v416_v50 = vsel %vm415_vm13, %v412_v47, 8  ;;  %vm1982_vm8 = vmand %vm333_vm4, %vm335_vm5  ;;  %vm364_vm4 = vcmp.ge.s32.totalorder %v1971_v55, 0  ;;  %vm334_vm5 = vcmp.ge.s32.totalorder %v1642_v33, 0  ;;  %vm336_vm6 = vcmp.lt.s32.totalorder %v1642_v33, 16 }
  0x89   : > { %v801_v53 = vperm.slane %v416_v50, 2  ;;  %v802_v31 = vperm.slane %v416_v50, 6  ;;  %vm349_vm13 = vmand %vm1982_vm8, %vm1986_vm9  ;;  %vm2002_vm0 = vcmp.ne.s32.totalorder %v1042_v7, 0  ;;  %vm383_vm8 = vcmp.ne.s32.totalorder %v1044_v14, 0 }
  0x8a   : > { %vm2006_vm1 = vmand %vm349_vm13, %vm359_vm14  ;;  %v366_v34 = vsel %vm364_vm4, 1, %v1480_v1 }
  0x8b   : > { %v804_v58 = vperm.slane %v801_v53, 2  ;;  %v805_v13 = vperm.slane %v802_v31, 2  ;;  %vm373_vm9 = vmand %vm2006_vm1, %vm2002_vm0  ;;  %v1043_v43 = vrot.slane %v366_v34, 10 }
  0x8c   : > { %1193 = vmatpush.bf16.msk.msrb.mxu1 %vm1192_vm11, %v1479_v63  ;;  %vm340_vm11 = vcmp.ge.s32.totalorder %v1649_v45, 0  ;;  %vm385_vm13 = vmand %vm373_vm9, %vm383_vm8 }
  0x8d   : > { %vm807_vm7 = vcmp.eq.s32.totalorder %v804_v58, %v1646_v41  ;;  %vm810_vm10 = vcmp.eq.s32.totalorder %v804_v58, %v1910_v25  ;;  %v342_v11 = vsel %vm340_vm11, 1, %v1480_v1  ;;  %vm811_vm2 = vcmp.eq.s32.totalorder %v805_v13, %v1910_v25  ;;  %vm2024_vm11 = vmand %vm334_vm5, %vm336_vm6 }
  0x8e   : > { %v1039_v45 = vrot.slane %v342_v11, 9  ;;  %v847_v49 = vsel %vm385_vm13, 1, %v1480_v1  ;;  %vm2045_vm4 = vcmp.ne.s32.totalorder %v1043_v43, 0 }
  0x8f   : > { %781 = vmatmul.bf16.vlgmr.msrb.gmra.mxu1 %v1123_v28  ;;  %v803_v28 = vperm.slane %v418_v19, 2 }
  0x90   : > { %vm2028_vm12 = vcmp.ne.s32.totalorder %v1039_v45, 0 }
  0x91   : > { %v806_v40 = vperm.slane %v803_v28, 2  ;;  %vm350_vm14 = vmand %vm2024_vm11, %vm2028_vm12 }
  0x93   : > { %vm812_vm0 = vcmp.eq.s32.totalorder %v806_v40, %v1910_v25  ;;  %vm809_vm1 = vcmp.eq.s32.totalorder %v806_v40, %v1646_v41  ;;  %v849_v25 = vperm.slane %v847_v49, 0 }
  0x95   : > { %vm852_vm9 = vcmp.ne.s32.totalorder %v849_v25, 0 }
  0xec   : > { %v740_v51 = vpop.f32.mrf.mxu1 }
  0xf4   : > { %v768_v48 = vpop.f32.mrf.mxu3  ;;  %v742_v62 = vpop.f32.mrf.mxu1 }
  0xfc   : > { %v726_v54 = vpop.f32.mrf.mxu0  ;;  %v770_v57 = vpop.f32.mrf.mxu3 }
  0xfd   : > { %v741_v4 = vadd.f32 %v740_v51, %v726_v54 }
  0xff   : > { %v813_v12 = vsel %vm807_vm7, %v741_v4, 0.0  ;;  %vm808_vm7 = vcmp.eq.s32.totalorder %v805_v13, %v1646_v41 }
 0x103   : > { %v754_v63 = vpop.f32.mrf.mxu2 }
 0x104   : > { %v728_v24 = vpop.f32.mrf.mxu0  ;;  %v796_v16 = vpop.f32.mrf.mxu3  ;;  %v769_v22 = vadd.f32 %v768_v48, %v754_v63 }
 0x105   : > { %v743_v9 = vadd.f32 %v742_v62, %v728_v24  ;;  %v850_v62 = vperm.slane %v847_v49, 4 }
 0x106   : > { %v814_v37 = vsel %vm808_vm7, %v769_v22, 0.0  ;;  %v896_v22 = vld [vmem:[%s259_s19] sm:$0x7] }
 0x107   : > { %v816_v10 = vsel %vm810_vm10, %v743_v9, 0.0  ;;  %vm376_vm10 = vcmp.lt.s32.totalorder %v1971_v55, 9 }
 0x108   : > { %v820_v15 = vsel %vm819_vm3, %v816_v10, 0.0  ;;  %v378_v44 = vsel %vm376_vm10, 1, %v1480_v1  ;;  %vm853_vm10 = vcmp.ne.s32.totalorder %v850_v62, 0 }
 0x109   : > { %v821_v18 = vadd.f32 %v820_v15, %v813_v12  ;;  %v1045_v51 = vrot.slane %v378_v44, 10 }
 0x10b   : > { %v822_v23 = vrot.slane %v821_v18, 4  ;;  %v756_v27 = vpop.f32.mrf.mxu2  ;;  %vm384_vm6 = vcmp.ne.s32.totalorder %v1045_v51, 0 }
 0x10c   : > { %v782_v26 = vpop.f32.mrf.mxu1  ;;  %v771_v29 = vadd.f32 %v770_v57, %v756_v27  ;;  %v798_v50 = vpop.f32.mrf.mxu3 }
 0x10d   : > { %v823_v30 = vadd.f32 %v822_v23, %v821_v18  ;;  %v797_v0 = vadd.f32 %v796_v16, %v782_v26 }
 0x10e   : > { %v817_v35 = vsel %vm811_vm2, %v771_v29, 0.0  ;;  %vm2041_vm2 = vmand %vm350_vm14, %vm360_vm15 }
 0x10f   : > { %v824_v38 = vrot.slane %v823_v30, 2  ;;  %v828_v39 = vsel %vm819_vm3, %v817_v35, 0.0  ;;  %v815_v60 = vsel %vm809_vm1, %v797_v0, 0.0  ;;  %vm374_vm5 = vmand %vm2041_vm2, %vm2045_vm4  ;;  %vm888_vm1 = vcmask 1041409  }
 0x110   : > { %v829_v42 = vadd.f32 %v828_v39, %v814_v37  ;;  %vm386_vm7 = vmand %vm374_vm5, %vm384_vm6  ;;  %vm889_vm2 = vsmask.f32 1024 }
 0x111   : > { %v825_v46 = vadd.f32 %v824_v38, %v823_v30  ;;  %v848_v5 = vsel %vm386_vm7, 1, %v1480_v1 }
 0x112   : > { %v830_v47 = vrot.slane %v829_v42, 4  ;;  %v851_v7 = vperm.slane %v848_v5, 0 }
 0x113   : > { %v826_v48 = vrot.slane %v825_v46, 1 }
 0x114   : > { %v784_v52 = vpop.f32.mrf.mxu1  ;;  %v831_v53 = vadd.f32 %v830_v47, %v829_v42  ;;  %vm854_vm4 = vcmp.ne.s32.totalorder %v851_v7, 0 }
 0x115   : > { %v799_v56 = vadd.f32 %v798_v50, %v784_v52  ;;  %v827_v59 = vadd.f32 %v826_v48, %v825_v46 }
 0x116   : > { %v832_v57 = vrot.slane %v831_v53, 2 }
 0x117   : > { %v818_v58 = vsel %vm812_vm0, %v799_v56, 0.0  ;;  %vm844_vm8 = vcmp.gt.f32.partialorder %v827_v59, 0.5  ;;  %vm886_vm0 = vsmask.f32 0 }
 0x118   : > { %v836_v41 = vsel %vm819_vm3, %v818_v58, 0.0  ;;  %v833_v61 = vadd.f32 %v832_v57, %v831_v53  ;;  %vm855_vm11 = vmand %vm844_vm8, %vm852_vm9 }
 0x119   : > { %v837_v63 = vadd.f32 %v836_v41, %v815_v60  ;;  %vm858_vm15 = vmpackc.low %vm855_vm11, %vm855_vm11  ;;  %vm892_vm11 = vcmask 1042434  }
 0x11a   : > { %v834_v31 = vrot.slane %v833_v61, 1  ;;  %v859_v11 = vsel %vm858_vm15, 16711935, %v1480_v1  ;;  %vm2059_vm6 = vmand %vm819_vm3, %vm886_vm0 }
 0x11b   : > { %v838_v2 = vrot.slane %v837_v63, 4  ;;  %vm2063_vm8 = vmand %vm888_vm1, %vm889_vm2  ;;  %v861_v15 = vpack.c.b8 %v859_v11, %v859_v11  ;;  %vm881_vm1 = vcmask 1041408  }
 0x11c   : > { %v835_v3 = vadd.f32 %v834_v31, %v833_v61 }
 0x11d   : > { %v839_v4 = vadd.f32 %v838_v2, %v837_v63 }
 0x11e   : > { %vm845_vm12 = vcmp.gt.f32.partialorder %v835_v3, 0.5 }
 0x11f   : > { %v840_v6 = vrot.slane %v839_v4, 2  ;;  %vm856_vm13 = vmand %vm845_vm12, %vm853_vm10  ;;  %vm893_vm12 = vsmask.f32 2048 }
 0x120   : > { %vm863_vm14 = vmpackc.low %vm856_vm13, %vm856_vm13 }
 0x121   : > { %v841_v24 = vadd.f32 %v840_v6, %v839_v4  ;;  %v864_v8 = vsel %vm863_vm14, 16711935, %v1480_v1  ;;  %vm891_vm13 = vmor %vm2063_vm8, %vm2059_vm6  ;;  %vm862_vm14 = vnez %v861_v15 }
 0x122   : > { %v866_v9 = vpack.c.b8 %v864_v8, %v864_v8  ;;  %vm894_vm15 = vmand %vm892_vm11, %vm893_vm12  ;;  %v873_v45 = vsel %vm862_vm14, 16843009, %v1480_v1 }
 0x123   : > { %v842_v10 = vrot.slane %v841_v24, 1  ;;  %vm895_vm2 = vmor %vm894_vm15, %vm891_vm13 }
 0x124   : > { %vm867_vm5 = vnez %v866_v9 }
 0x125   : > { %v843_v12 = vadd.f32 %v842_v10, %v841_v24  ;;  %v874_v16 = vsel %vm867_vm5, 16843009, %v1480_v1 }
 0x126   : > { %v876_v19 = vrot.slane %v874_v16, 7 }
 0x127   : > { %vm846_vm7 = vcmp.gt.f32.partialorder %v843_v12, 0.5 }
 0x128   : > { %vm857_vm9 = vmand %vm846_vm7, %vm854_vm4  ;;  %v880_v23 = vsel %vm819_vm3, %v873_v45, %v876_v19 }
 0x129   : > { %vm868_vm10 = vmpackc.low %vm857_vm9, %vm857_vm9 }
 0x12a   : > { %v869_v17 = vsel %vm868_vm10, 16711935, %v1480_v1 }
 0x12b   : > { %v871_v18 = vpack.c.b8 %v869_v17, %v869_v17 }
 0x12d   : > { %vm872_vm0 = vnez %v871_v18 }
 0x12e   : > { %v875_v20 = vsel %vm872_vm0, 16843009, %v1480_v1 }
 0x12f   : > { %v877_v21 = vrot.slane %v875_v20, 6 }
 0x131   : > { %v883_v26 = vsel %vm881_vm1, %v880_v23, %v877_v21 }
 0x132   : > { %v897_v27 = vsel %vm895_vm2, %v883_v26, %v896_v22 }
 0x133   : > { %898 = vst [vmem:[%s259_s19] sm:$0x7] %v897_v27 }
 0x134   : > { %1421 = shalt.err (!%p1418_p11)
}
 0x135   : > { %1237 = dma.vmem_to_hbm [thread:$0]  (%p1579_p7), %s913_s29, 48, %s915_s30, %s900_s26  }
 0x136 PF: > { %s926_s25 = sand.u32 1, %s1460_s15   ;;  %p2139_p12 = scmp.ge.s32.totalorder %s1472_s18, 2 }
 0x137   : > { %s927_s10 = scalar_lea.sflag [#allocation4], %s926_s25 }
 0x138   : > { %p1254_p13 = pnand %p2139_p12, %p1541_p6 }
 0x13a   : > { %p1255_p0 = pneg %p1254_p13 }
 0x13c   : > { %1455 = dma.done.wait (%p1255_p0), %s927_s10, 48  }
 0x13d   : > { %1457 = vsyncadd (%p1255_p0), %s927_s10, 4294967248  ;;  %p20_p3 = scmp.ge.s32.totalorder %s1565_s13, 4   ;;  %s2140_s15 = smov %s1464_s16 }
 0x13e   : > { %s2141_s16 = smov %s1468_s17  ;;  %s2142_s17 = smov %s1575_s23 }
 0x13f   : > { %s2143_s18 = smov %s1565_s13  ;;  %22 = sbr.rel (!%p20_p3) target bundleno = 8 (0x8), region = 94 }
 0x144   :  { %933 = vsyncpa [#allocation3], 1 }
 0x145   :  { %935 = vsyncpa [#allocation3 + $0x1], 1 }
 0x146   :  { %936 = vsyncpa [#allocation10], 1 }
 0x147   :  { %937 = vsyncpa [#allocation4], 1 }
 0x148   :  { %939 = vsyncpa [#allocation4 + $0x1], 1 }
 0x149   :  { %940 = vsyncpa [#allocation5], 1 }
 0x14a   :  { %942 = vsyncpa [#allocation5 + $0x1], 1 }
 0x14b   :  { %943 = vsyncpa [#allocation7], 1 }

</bundles_post_ra>
